<compile_context>
chip_gen: v7x
topology: tpu7x:2x2x1
jax: 0.10.0
libtpu: 0.0.40
codegen_flags: <defaults>
</compile_context>

<pallas_src>
import functools

import jax
import jax.numpy as jnp
from jax.experimental import pallas as pl
from jax.experimental.pallas import tpu as pltpu


_NUM_HEADS = 4                      # torch forward requires head_dim == num_heads
_HEAD_DIM = 4
_EMBED = _NUM_HEADS * _HEAD_DIM     # 16
_LANES = 128                        # B*S must fill the lane axis exactly


def _attn_kernel(w_ref, xq_ref, xv_ref, o_ref, *, bs, e):
    """Single gridless step.

    w_ref  : (5*e, e+1)  packed [scale*Wq | scale*bq ; replicated Wv | bv]
    xq_ref : (bs, e)     query, sample-major (free reshape of (B, S, E))
    xv_ref : (bs, e)     value, sample-major
    o_ref  : (bs, e)     output, sample-major (wrapper reshape is free)
    """
    D = _HEAD_DIM

    # Feature-major activation slab with both projections' inputs packed along
    # the lane axis; the trailing ones row makes the bias column of w_ref ride
    # the (already K-padded) MXU matmul for free.
    x_t = jnp.concatenate([xq_ref[...].T, xv_ref[...].T], axis=1)        # (e, 2*bs)
    x_aug = jnp.concatenate(
        [x_t, jnp.ones((1, 2 * bs), jnp.float32)], axis=0)               # (e+1, 2*bs)

    # One MXU push/drain for both projections (block-diagonal use of result).
    full = jnp.dot(w_ref[...], x_aug,
                   preferred_element_type=jnp.float32)                   # (5e, 2*bs)

    # q_t row h*D+d, col t  =  scale * (query @ Wq^T + bq)[t, h*D+d].
    q_t = full[0:e, 0:bs]                                                # (16, 128)
    qa = q_t[0:8, :]      # heads 0/1 : row d -> (h=0, d), row d+4 -> (h=1, d)
    qb = q_t[8:16, :]     # heads 2/3

    # Softmax over the HEAD axis couples rows {d, d+4} of qa with those of qb;
    # the cross-head max/sum is plain VPU work plus two sublane rolls (XLU).
    m1 = jnp.maximum(qa, qb)
    m = jnp.maximum(m1, pltpu.roll(m1, shift=D, axis=0))
    ea = jnp.exp(qa - m)
    eb = jnp.exp(qb - m)
    z1 = ea + eb
    z = z1 + pltpu.roll(z1, shift=D, axis=0)
    inv = 1.0 / z                         # exact reciprocal (EUP has slack here)
    pa = ea * inv                         # row d -> P[0,d], row d+4 -> P[1,d]
    pb = eb * inv                         # row d -> P[2,d], row d+4 -> P[3,d]
    par = pltpu.roll(pa, shift=D, axis=0)  # row d -> P[1,d], row d+4 -> P[0,d]
    pbr = pltpu.roll(pb, shift=D, axis=0)  # row d -> P[3,d], row d+4 -> P[2,d]

    # dropout(p=0.0) is the identity -> elided.

    # Head-combine on whole (8,128) vregs: pack_params replicated the value
    # rows so 8-row block i of the value half lines up with prob slab
    # [pa, par, pb, pbr][i % 4] for output heads (0,1) (i < 4) / (2,3) (i >= 4).
    def vblk(i):
        return full[e + 8 * i:e + 8 * (i + 1), bs:2 * bs]                # (8, 128)

    out_top = pa * vblk(0) + par * vblk(1) + pb * vblk(2) + pbr * vblk(3)
    out_bot = pa * vblk(4) + par * vblk(5) + pb * vblk(6) + pbr * vblk(7)

    # Transpose back to sample-major in-kernel (small XLU job) so no XLA
    # transpose op / extra HBM round-trip is needed around the kernel.
    o_ref[...] = jnp.concatenate([out_top, out_bot], axis=0).T           # (bs, e)


def pack_params(params, scale_factor, num_heads):
    """One-time weight packing (hoist out of the per-call path).

    Folds the softmax scale into the query projection, the biases into a
    trailing weight column, and replicates the value-projection rows into the
    whole-vreg combine pattern used by the kernel.  Returns one (5E, E+1) f32
    slab.
    """
    wq, bq, wk, bk, wv, bv = params
    del wk, bk                    # key projection is dead code in the torch forward
    e = wq.shape[0]
    h = num_heads
    d = e // h
    assert h == _NUM_HEADS and d == h and e == _EMBED, (
        "kernel is specialized to embedding_size=16, num_heads=head_dim=4 "
        "(the torch forward requires head_dim == num_heads)")

    scale = jnp.asarray(scale_factor, jnp.float32)
    wq_aug = jnp.concatenate(
        [wq.astype(jnp.float32) * scale,
         (bq.astype(jnp.float32) * scale)[:, None]], axis=1)             # (E, E+1)
    wv_aug = jnp.concatenate(
        [wv.astype(jnp.float32), bv.astype(jnp.float32)[:, None]], axis=1)  # (E, E+1)

    # Row-replication map: 8 blocks of 8 rows.  Block i pairs prob slab
    # [pa, par, pb, pbr][i % 4] (source heads (k0, k1)) with output heads
    # (h0, h1) = (0, 1) for i < 4 and (2, 3) for i >= 4.
    k_pairs = [(0, 1), (1, 0), (2, 3), (3, 2)]
    rows = []
    for i in range(8):
        half, j = divmod(i, 4)
        k0, k1 = k_pairs[j]
        h0, h1 = 2 * half, 2 * half + 1
        rows += [h0 * d + k0] * d + [h1 * d + k1] * d
    wv_rep = wv_aug[jnp.asarray(rows, jnp.int32)]                        # (4E, E+1)

    return jnp.concatenate([wq_aug, wv_rep], axis=0)                     # (5E, E+1)


@jax.jit
def forward(w_packed, query, value):
    """Jitted steady-state path: (B, S, E) query/value -> (B, S, E) output."""
    b, s, e = query.shape
    bs = b * s
    assert e == _EMBED and bs == _LANES, "kernel specialized to E=16, B*S=128"
    assert w_packed.shape == (5 * e, e + 1)

    kernel = functools.partial(_attn_kernel, bs=bs, e=e)
    out = pl.pallas_call(
        kernel,
        out_shape=jax.ShapeDtypeStruct((bs, e), jnp.float32),
        in_specs=[
            pl.BlockSpec(memory_space=pltpu.MemorySpace.VMEM),   # packed weights
            pl.BlockSpec(memory_space=pltpu.MemorySpace.VMEM),   # query  (B*S, E)
            pl.BlockSpec(memory_space=pltpu.MemorySpace.VMEM),   # value  (B*S, E)
        ],
        out_specs=pl.BlockSpec(memory_space=pltpu.MemorySpace.VMEM),
        # Gridless single step: whole working set is ~50 KiB of VMEM; a grid
        # (or v7x's second TensorCore) would only add per-step overhead.  If
        # B*S grows far beyond 128, tile the lane axis with a
        # dimension_semantics=("parallel",) grid instead.
    )(w_packed, query.reshape(bs, e), value.reshape(bs, e))
    return out.reshape(b, s, e)


def model_forward(query, key, value, scale_factor, params, num_heads):
    """Torch-signature convenience wrapper.  For repeated calls, hoist
    pack_params(...) out of the loop and call forward(...) directly."""
    del key                                   # dead code in the torch forward
    return forward(pack_params(params, scale_factor, num_heads), query, value)


def ref_forward(query, key, value, scale_factor, params, num_heads):
    """Pure-JAX mirror of the torch forward (for verification)."""
    wq, bq, wk, bk, wv, bv = params
    hp = jax.lax.Precision.HIGHEST
    q = jnp.dot(query, wq.T, precision=hp) + bq
    k = jnp.dot(key, wk.T, precision=hp) + bk
    v = jnp.dot(value, wv.T, precision=hp) + bv
    del k  # unused by the torch forward
    B, S, E = q.shape
    D = E // num_heads
    q_t = jnp.swapaxes(q.reshape(B, S, num_heads, D), 2, 3)
    v_t = jnp.swapaxes(v.reshape(B, S, num_heads, D), 2, 3)
    p = jax.nn.softmax(q_t * scale_factor, axis=-1)
    out = jnp.matmul(p, v_t, precision=hp)
    return jnp.swapaxes(out, 2, 3).reshape(B, S, E)


if __name__ == "__main__":
    B = 8
    EMBED = 16
    NUM_HEADS = 4          # head_dim = EMBED // NUM_HEADS = 4 == NUM_HEADS (required)
    SEQ = 16               # B * SEQ = 128 fills the lane axis

    root = jax.random.PRNGKey(0)
    ks = jax.random.split(root, 10)

    query = jax.random.uniform(ks[0], (B, SEQ, EMBED), jnp.float32)
    key_in = jax.random.uniform(ks[1], (B, SEQ, EMBED), jnp.float32)
    value = jax.random.uniform(ks[2], (B, SEQ, EMBED), jnp.float32)
    scale_factor = jax.random.uniform(ks[3], (), jnp.float32)

    bound = 1.0 / (EMBED ** 0.5)
    wq = jax.random.uniform(ks[4], (EMBED, EMBED), jnp.float32, -bound, bound)
    bq = jax.random.uniform(ks[5], (EMBED,), jnp.float32, -bound, bound)
    wk = jax.random.uniform(ks[6], (EMBED, EMBED), jnp.float32, -bound, bound)
    bk = jax.random.uniform(ks[7], (EMBED,), jnp.float32, -bound, bound)
    wv = jax.random.uniform(ks[8], (EMBED, EMBED), jnp.float32, -bound, bound)
    bv = jax.random.uniform(ks[9], (EMBED,), jnp.float32, -bound, bound)
    params = (wq, bq, wk, bk, wv, bv)

    # One-time prep (hoisted), then the jitted kernel path.
    w_packed = pack_params(params, scale_factor, NUM_HEADS)
    out = forward(w_packed, query, value)
    out = jax.block_until_ready(out)

    ref = ref_forward(query, key_in, value, scale_factor, params, NUM_HEADS)
    assert out.shape == (B, SEQ, EMBED)
    # Exact softmax reciprocal now -> tight tolerance (covers MXU f32 rounding).
    assert jnp.allclose(out, ref, atol=1e-4, rtol=1e-4), "mismatch vs JAX reference"

    print("KERNEL_OK")
</pallas_src>

<mosaic_0001>
module attributes {stable_mosaic.version = 11 : i64} {
  func.func @_attn_kernel(%arg0: memref<80x17xf32, #tpu.memory_space<vmem>>, %arg1: memref<128x16xf32, #tpu.memory_space<vmem>>, %arg2: memref<128x16xf32, #tpu.memory_space<vmem>>, %arg3: memref<128x16xf32, #tpu.memory_space<vmem>>) attributes {dimension_semantics = [], scalar_prefetch = 0 : i64, scratch_operands = 0 : i64, tpu.core_type = #tpu.core_type<tc>} {
    %c0 = arith.constant 0 : index
    %c0_0 = arith.constant 0 : index
    %0 = vector.load %arg1[%c0, %c0_0] : memref<128x16xf32, #tpu.memory_space<vmem>>, vector<128x16xf32>
    %1 = tpu.transpose %0, [1, 0] : vector<128x16xf32> -> vector<16x128xf32>
    %c0_1 = arith.constant 0 : index
    %c0_2 = arith.constant 0 : index
    %2 = vector.load %arg2[%c0_1, %c0_2] : memref<128x16xf32, #tpu.memory_space<vmem>>, vector<128x16xf32>
    %3 = tpu.transpose %2, [1, 0] : vector<128x16xf32> -> vector<16x128xf32>
    %4 = tpu.concatenate %1, %3 in 1 : vector<16x128xf32>, vector<16x128xf32> -> vector<16x256xf32>
    %cst = arith.constant 1.000000e+00 : f32
    %5 = vector.broadcast %cst : f32 to vector<1x256xf32>
    %6 = tpu.concatenate %4, %5 in 0 : vector<16x256xf32>, vector<1x256xf32> -> vector<17x256xf32>
    %c0_3 = arith.constant 0 : index
    %c0_4 = arith.constant 0 : index
    %7 = vector.load %arg0[%c0_3, %c0_4] : memref<80x17xf32, #tpu.memory_space<vmem>>, vector<80x17xf32>
    %cst_5 = arith.constant dense<0.000000e+00> : vector<80x256xf32>
    %8 = tpu.matmul %7, %6, %cst_5 {dimension_numbers = #tpu.dot_dimension_numbers<[1], [0], [0], [1], [0, 0, 1, 1], [], []>} : vector<80x17xf32>, vector<17x256xf32>, vector<80x256xf32> -> vector<80x256xf32>
    %9 = vector.extract_strided_slice %8 {offsets = [0, 0], sizes = [16, 128], strides = [1, 1]} : vector<80x256xf32> to vector<16x128xf32>
    %10 = vector.extract_strided_slice %9 {offsets = [0, 0], sizes = [8, 128], strides = [1, 1]} : vector<16x128xf32> to vector<8x128xf32>
    %11 = vector.extract_strided_slice %9 {offsets = [8, 0], sizes = [8, 128], strides = [1, 1]} : vector<16x128xf32> to vector<8x128xf32>
    %12 = arith.maximumf %10, %11 : vector<8x128xf32>
    %c4_i32 = arith.constant 4 : i32
    %13 = tpu.dynamic_rotate %12 by %c4_i32 dim 0 : vector<8x128xf32>, i32 -> vector<8x128xf32>
    %14 = arith.maximumf %12, %13 : vector<8x128xf32>
    %15 = arith.subf %10, %14 : vector<8x128xf32>
    %16 = math.exp %15 : vector<8x128xf32>
    %17 = arith.subf %11, %14 : vector<8x128xf32>
    %18 = math.exp %17 : vector<8x128xf32>
    %19 = arith.addf %16, %18 : vector<8x128xf32>
    %c4_i32_6 = arith.constant 4 : i32
    %20 = tpu.dynamic_rotate %19 by %c4_i32_6 dim 0 : vector<8x128xf32>, i32 -> vector<8x128xf32>
    %21 = arith.addf %19, %20 : vector<8x128xf32>
    %cst_7 = arith.constant 1.000000e+00 : f32
    %22 = vector.broadcast %cst_7 : f32 to vector<8x128xf32>
    %23 = arith.divf %22, %21 : vector<8x128xf32>
    %24 = arith.mulf %16, %23 : vector<8x128xf32>
    %25 = arith.mulf %18, %23 : vector<8x128xf32>
    %c4_i32_8 = arith.constant 4 : i32
    %26 = tpu.dynamic_rotate %24 by %c4_i32_8 dim 0 : vector<8x128xf32>, i32 -> vector<8x128xf32>
    %c4_i32_9 = arith.constant 4 : i32
    %27 = tpu.dynamic_rotate %25 by %c4_i32_9 dim 0 : vector<8x128xf32>, i32 -> vector<8x128xf32>
    %28 = vector.extract_strided_slice %8 {offsets = [16, 128], sizes = [8, 128], strides = [1, 1]} : vector<80x256xf32> to vector<8x128xf32>
    %29 = arith.mulf %24, %28 : vector<8x128xf32>
    %30 = vector.extract_strided_slice %8 {offsets = [24, 128], sizes = [8, 128], strides = [1, 1]} : vector<80x256xf32> to vector<8x128xf32>
    %31 = arith.mulf %26, %30 : vector<8x128xf32>
    %32 = arith.addf %29, %31 : vector<8x128xf32>
    %33 = vector.extract_strided_slice %8 {offsets = [32, 128], sizes = [8, 128], strides = [1, 1]} : vector<80x256xf32> to vector<8x128xf32>
    %34 = arith.mulf %25, %33 : vector<8x128xf32>
    %35 = arith.addf %32, %34 : vector<8x128xf32>
    %36 = vector.extract_strided_slice %8 {offsets = [40, 128], sizes = [8, 128], strides = [1, 1]} : vector<80x256xf32> to vector<8x128xf32>
    %37 = arith.mulf %27, %36 : vector<8x128xf32>
    %38 = arith.addf %35, %37 : vector<8x128xf32>
    %39 = vector.extract_strided_slice %8 {offsets = [48, 128], sizes = [8, 128], strides = [1, 1]} : vector<80x256xf32> to vector<8x128xf32>
    %40 = arith.mulf %24, %39 : vector<8x128xf32>
    %41 = vector.extract_strided_slice %8 {offsets = [56, 128], sizes = [8, 128], strides = [1, 1]} : vector<80x256xf32> to vector<8x128xf32>
    %42 = arith.mulf %26, %41 : vector<8x128xf32>
    %43 = arith.addf %40, %42 : vector<8x128xf32>
    %44 = vector.extract_strided_slice %8 {offsets = [64, 128], sizes = [8, 128], strides = [1, 1]} : vector<80x256xf32> to vector<8x128xf32>
    %45 = arith.mulf %25, %44 : vector<8x128xf32>
    %46 = arith.addf %43, %45 : vector<8x128xf32>
    %47 = vector.extract_strided_slice %8 {offsets = [72, 128], sizes = [8, 128], strides = [1, 1]} : vector<80x256xf32> to vector<8x128xf32>
    %48 = arith.mulf %27, %47 : vector<8x128xf32>
    %49 = arith.addf %46, %48 : vector<8x128xf32>
    %50 = tpu.concatenate %38, %49 in 0 : vector<8x128xf32>, vector<8x128xf32> -> vector<16x128xf32>
    %51 = tpu.transpose %50, [1, 0] : vector<16x128xf32> -> vector<128x16xf32>
    %c0_10 = arith.constant 0 : index
    %c0_11 = arith.constant 0 : index
    %52 = vector.load %arg3[%c0_10, %c0_11] : memref<128x16xf32, #tpu.memory_space<vmem>>, vector<128x16xf32>
    tpu.vector_store %arg3[%c0_10, %c0_11], %51 {strides = array<i32>} : memref<128x16xf32, #tpu.memory_space<vmem>>, vector<128x16xf32>,
    return
  }
}

</mosaic_0001>

<bundles_post_ra>
// kernel: forward.1
= control target key start
LH: loop header
LB: loop body
LE: loop exit
PB: predicated region body
PF: predicated region fallthrough
CT: control target
= control target key end

     0   :  { %8 = vsyncpa [#allocation3], 0  ;;  %s683_s0 = inlined_call_operand.vmem [shape: f32[80,17], index: 0, kind: input, shape index: {}]   ;;  %s684_s1 = inlined_call_operand.hbm [shape: f32[128,16], index: 1, kind: input, shape index: {}]   ;;  %s685_s2 = inlined_call_operand.hbm [shape: f32[128,16], index: 2, kind: input, shape index: {}]   ;;  %s686_s3 = inlined_call_operand.hbm [shape: f32[128,16], index: 3, kind: output, shape index: {}]  }
   0x1   :  { %9 = vsyncpa [#allocation6], 0 }
   0x2   :  { %10 = vsyncpa [#allocation4], 0  ;;  %s545_s12 = smov [#allocation2]   ;;  %s473_s16 = scalar_lea.hbm %s684_s1, 2048 }
   0x3   :  { %s18_s13 = sshll.u32 %s545_s12, 4  ;;  %p474_p0 = scmp.ne.s32.totalorder %s684_s1, %s473_s16  ;;  %s19_s13 = int_to_ptr.vmem [resolvable:$true] %s18_s13 }
   0x4   :  { %p477_p1 = scmp.lt.u32.totalorder %s473_s16, %s684_s1 }
   0x6   :  { %p479_p2 = pnand %p477_p1, %p474_p0 }
   0x8   :  { %482 = shalt.err (!%p479_p2)
}
   0x9   :  { %s483_s21 = scalar_lea.vmem %s19_s13, 2048  ;;  %p488_p4 = scmp.lt.s32.totalorder %s19_s13, %s19_s13 }
   0xa   :  { %p484_p3 = scmp.ne.s32.totalorder %s19_s13, %s483_s21  ;;  %p489_p5 = scmp.lt.s32.totalorder %s483_s21, %s483_s21 }
   0xc   :  { %p490_p6 = por %p489_p5, %p488_p4 }
   0xe   :  { %p491_p7 = pnand %p490_p6, %p484_p3 }
  0x10   :  { %494 = shalt.err (!%p491_p7)
}
  0x11   :  { %s546_s22 = smov 128   ;;  %s547_s23 = smov 8  }
  0x12   :  { %24 = dma.hbm_to_vmem [thread:$0]  %s684_s1, 2048, %s19_s13, [#allocation3], %s546_s22, %s546_s22, %s547_s23  }
  0x13   :  { %s548_s26 = smov [#allocation5]   ;;  %s495_s30 = scalar_lea.hbm %s685_s2, 2048 }
  0x14   :  { %s30_s27 = sshll.u32 %s548_s26, 4  ;;  %p496_p8 = scmp.ne.s32.totalorder %s685_s2, %s495_s30  ;;  %s31_s27 = int_to_ptr.vmem [resolvable:$true] %s30_s27 }
  0x15   :  { %p499_p9 = scmp.lt.u32.totalorder %s495_s30, %s685_s2 }
  0x17   :  { %p501_p10 = pnand %p499_p9, %p496_p8 }
  0x19   :  { %504 = shalt.err (!%p501_p10)
}
  0x1a   :  { %s505_s8 = scalar_lea.vmem %s31_s27, 2048  ;;  %p510_p12 = scmp.lt.s32.totalorder %s31_s27, %s31_s27 }
  0x1b   :  { %p506_p11 = scmp.ne.s32.totalorder %s31_s27, %s505_s8  ;;  %p511_p13 = scmp.lt.s32.totalorder %s505_s8, %s505_s8 }
  0x1d   :  { %p512_p0 = por %p511_p13, %p510_p12 }
  0x1f   :  { %p513_p1 = pnand %p512_p0, %p506_p11 }
  0x21   :  { %516 = shalt.err (!%p513_p1)
}
  0x22   :  { %36 = dma.hbm_to_vmem [thread:$0]  %s685_s2, 2048, %s31_s27, [#allocation6], %s546_s22, %s546_s22, %s547_s23  }
  0x23   :  { %539 = dma.done.wait [#allocation3], 2048  }
  0x24   :  { %540 = vsyncadd [#allocation3], 4294965248 }
  0x25   :  { %541 = dma.done.wait [#allocation6], 2048  }
  0x26   :  { %542 = vsyncadd [#allocation6], 4294965248  ;;  %v43_v0 = vld [vmem:[#allocation2] sm:$0xff]  ;;  %v44_v2 = vld [vmem:[#allocation2 + $0x8] sm:$0xff]  ;;  %v549_v17 = vmov 0.0   ;;  %vm180_vm0 = vcmask 1040384  }
  0x27   :  { %v91_v1 = vld [vmem:[#allocation5] sm:$0xff]  ;;  %v92_v4 = vld [vmem:[#allocation5 + $0x8] sm:$0xff]  ;;  %v45_v6 = vld [vmem:[#allocation2 + $0x10] sm:$0xff]  ;;  %248 = vmatprep.mubr.f32.mxu0 %v549_v17  ;;  %273 = vmatprep.mubr.f32.mxu1 %v549_v17  ;;  %v550_v57 = vmov 1.0   ;;  %vm149_vm1 = vcmask 138240   ;;  %vm363_vm2 = vcmask 130048  }
  0x28   :  { %v425_v3 = vpack.i.bf16 %v43_v0, %v91_v1  ;;  %v427_v5 = vpack.i.bf16 %v44_v2, %v92_v4  ;;  %v93_v7 = vld [vmem:[#allocation5 + $0x10] sm:$0xff]  ;;  %v46_v9 = vld [vmem:[#allocation2 + $0x18] sm:$0xff]  ;;  %v47_v12 = vld [vmem:[#allocation2 + $0x20] sm:$0xff] }
  0x29   :  { %v429_v8 = vpack.i.bf16 %v45_v6, %v93_v7  ;;  %v94_v10 = vld [vmem:[#allocation5 + $0x18] sm:$0xff]  ;;  %v95_v13 = vld [vmem:[#allocation5 + $0x20] sm:$0xff]  ;;  %v48_v15 = vld [vmem:[#allocation2 + $0x28] sm:$0xff] }
  0x2a   :  { %426 = vxpose.xlu0.b32.start [1/16] (narrow) %v425_v3, 16  ;;  %v431_v11 = vpack.i.bf16 %v46_v9, %v94_v10  ;;  %v433_v14 = vpack.i.bf16 %v47_v12, %v95_v13  ;;  %v96_v16 = vld [vmem:[#allocation5 + $0x28] sm:$0xff]  ;;  %v49_v19 = vld [vmem:[#allocation2 + $0x30] sm:$0xff]  ;;  %v50_v22 = vld [vmem:[#allocation2 + $0x38] sm:$0xff] }
  0x2b   :  { %v435_v18 = vpack.i.bf16 %v48_v15, %v96_v16  ;;  %v97_v20 = vld [vmem:[#allocation5 + $0x30] sm:$0xff]  ;;  %v98_v23 = vld [vmem:[#allocation5 + $0x38] sm:$0xff]  ;;  %v51_v25 = vld [vmem:[#allocation2 + $0x40] sm:$0xff] }
  0x2c   :  { %v437_v21 = vpack.i.bf16 %v49_v19, %v97_v20  ;;  %v439_v24 = vpack.i.bf16 %v50_v22, %v98_v23  ;;  %v99_v26 = vld [vmem:[#allocation5 + $0x40] sm:$0xff]  ;;  %v52_v28 = vld [vmem:[#allocation2 + $0x48] sm:$0xff]  ;;  %v53_v31 = vld [vmem:[#allocation2 + $0x50] sm:$0xff] }
  0x2d   :  { %v441_v27 = vpack.i.bf16 %v51_v25, %v99_v26  ;;  %v100_v29 = vld [vmem:[#allocation5 + $0x48] sm:$0xff]  ;;  %v101_v32 = vld [vmem:[#allocation5 + $0x50] sm:$0xff]  ;;  %v54_v34 = vld [vmem:[#allocation2 + $0x58] sm:$0xff] }
  0x2e   :  { %428 = vxpose.xlu0.b32.cont [2/16] (narrow) %v427_v5, 16  ;;  %v443_v30 = vpack.i.bf16 %v52_v28, %v100_v29  ;;  %v445_v33 = vpack.i.bf16 %v53_v31, %v101_v32  ;;  %v102_v35 = vld [vmem:[#allocation5 + $0x58] sm:$0xff]  ;;  %v55_v37 = vld [vmem:[#allocation2 + $0x60] sm:$0xff]  ;;  %v56_v40 = vld [vmem:[#allocation2 + $0x68] sm:$0xff] }
  0x2f   :  { %v447_v36 = vpack.i.bf16 %v54_v34, %v102_v35  ;;  %v103_v38 = vld [vmem:[#allocation5 + $0x60] sm:$0xff]  ;;  %v104_v41 = vld [vmem:[#allocation5 + $0x68] sm:$0xff]  ;;  %v57_v43 = vld [vmem:[#allocation2 + $0x70] sm:$0xff] }
  0x30   :  { %v449_v39 = vpack.i.bf16 %v55_v37, %v103_v38  ;;  %v451_v42 = vpack.i.bf16 %v56_v40, %v104_v41  ;;  %v105_v44 = vld [vmem:[#allocation5 + $0x70] sm:$0xff]  ;;  %v58_v46 = vld [vmem:[#allocation2 + $0x78] sm:$0xff]  ;;  %v139_v58 = vld [vmem:[%s683_s0] sm:$0xff] }
  0x31   :  { %v453_v45 = vpack.i.bf16 %v57_v43, %v105_v44  ;;  %v106_v47 = vld [vmem:[#allocation5 + $0x78] sm:$0xff]  ;;  %v144_v59 = vld [vmem:[%s683_s0 + $0x28] sm:$0xff]  ;;  %v145_v61 = vld [vmem:[%s683_s0 + $0x30] sm:$0xff] }
  0x32   :  { %430 = vxpose.xlu0.b32.cont [3/16] (narrow) %v429_v8, 16  ;;  %v455_v48 = vpack.i.bf16 %v58_v46, %v106_v47  ;;  %v140_v60 = vld [vmem:[%s683_s0 + $0x8] sm:$0xff]  ;;  %v141_v62 = vld [vmem:[%s683_s0 + $0x10] sm:$0xff]  ;;  %v146_v63 = vld [vmem:[%s683_s0 + $0x38] sm:$0xff] }
  0x33   :  { %v142_v0 = vld [vmem:[%s683_s0 + $0x18] sm:$0xff]  ;;  %v147_v1 = vld [vmem:[%s683_s0 + $0x40] sm:$0xff]  ;;  %v148_v3 = vld [vmem:[%s683_s0 + $0x48] sm:$0xff] }
  0x34   :  { %v143_v2 = vld [vmem:[%s683_s0 + $0x20] sm:$0xff]  ;;  %s551_s0 = smov [#allocation7]  }
  0x35   :  { %s385_s4 = sshll.u32 %s551_s0, 4  ;;  %s386_s4 = int_to_ptr.vmem [resolvable:$true] %s385_s4 }
  0x36   :  { %432 = vxpose.xlu0.b32.cont [4/16] (narrow) %v431_v11, 16  ;;  %s517_s5 = scalar_lea.vmem %s386_s4, 2048  ;;  %p522_p3 = scmp.lt.s32.totalorder %s386_s4, %s386_s4 }
  0x37   :  { %p518_p2 = scmp.ne.s32.totalorder %s386_s4, %s517_s5  ;;  %p523_p4 = scmp.lt.s32.totalorder %s517_s5, %s517_s5 }
  0x39   :  { %p524_p5 = por %p523_p4, %p522_p3 }
  0x3a   :  { %434 = vxpose.xlu0.b32.cont [5/16] (narrow) %v433_v14, 16 }
  0x3b   :  { %p525_p6 = pnand %p524_p5, %p518_p2 }
  0x3e   :  { %436 = vxpose.xlu0.b32.cont [6/16] (narrow) %v435_v18, 16 }
  0x42   :  { %438 = vxpose.xlu0.b32.cont [7/16] (narrow) %v437_v21, 16 }
  0x46   :  { %440 = vxpose.xlu0.b32.cont [8/16] (narrow) %v439_v24, 16 }
  0x4a   :  { %442 = vxpose.xlu0.b32.cont [9/16] (narrow) %v441_v27, 16 }
  0x4e   :  { %444 = vxpose.xlu0.b32.cont [10/16] (narrow) %v443_v30, 16 }
  0x52   :  { %446 = vxpose.xlu0.b32.cont [11/16] (narrow) %v445_v33, 16 }
  0x56   :  { %448 = vxpose.xlu0.b32.cont [12/16] (narrow) %v447_v36, 16 }
  0x5a   :  { %450 = vxpose.xlu0.b32.cont [13/16] (narrow) %v449_v39, 16 }
  0x5e   :  { %452 = vxpose.xlu0.b32.cont [14/16] (narrow) %v451_v42, 16 }
  0x62   :  { %454 = vxpose.xlu0.b32.cont [15/16] (narrow) %v453_v45, 16 }
  0x66   :  { %456 = vxpose.xlu0.b32.end [16/16] (narrow) %v455_v48, 16 }
  0xaa   :  { %v457_v49 = vpop.trf.xlu0 }
  0xab   :  { %v458_v51 = vunpack.i.l.bf16 %v457_v49  ;;  %v461_v52 = vunpack.i.h.bf16 %v457_v49 }
  0xae   :  { %v462_v50 = vpop.trf.xlu0 }
  0xaf   :  { %v463_v53 = vunpack.i.l.bf16 %v462_v50  ;;  %v466_v54 = vunpack.i.h.bf16 %v462_v50 }
  0xb1   :  { %v410_v55 = vpack.c.bf16 %v463_v53, %v458_v51  ;;  %v412_v56 = vpack.c.bf16 %v466_v54, %v461_v52 }
  0xb3   :  { %411 = vmatprep.subr.bf16.mxu0 %v410_v55  ;;  %414 = vmatprep.subr.bf16.mxu1 %v410_v55 }
  0xb4   :  { %413 = vmatpush1.bf16.msra.mxu0 %v412_v56  ;;  %416 = vmatpush1.bf16.msra.mxu1 %v412_v56 }
  0xb5   :  { %398 = vmatprep.subr.msk.mxu0 %vm180_vm0, %v550_v57  ;;  %415 = vmatprep.subr.msk.mxu1 %vm180_vm0, %v550_v57 }
  0xb8   :  { %399 = vmatpush1.msk.msra.mxu0 %vm180_vm0, %v550_v57  ;;  %417 = vmatpush1.msk.msra.mxu1 %vm180_vm0, %v550_v57 }
  0xb9   :  { %400 = vmatmul.mubr.msk.f32.vlgmr.msra.gmra.mrb[0].mxu0 %vm149_vm1, %v139_v58  ;;  %405 = vmatmul.mubr.msk.f32.vlgmr.msra.gmra.mrb[0].mxu1 %vm149_vm1, %v144_v59 }
  0xba   :  { %253 = vmatprep.mubr.f32.mxu0 %v549_v17  ;;  %278 = vmatprep.mubr.f32.mxu1 %v549_v17 }
  0xbd   :  { %401 = vmatmul.mubr.msk.f32.gmra.mrb[2].mxu0 %vm149_vm1, %v140_v60  ;;  %406 = vmatmul.mubr.msk.f32.gmra.mrb[2].mxu1 %vm149_vm1, %v145_v61 }
  0xbe   :  { %258 = vmatprep.mubr.f32.mxu0 %v549_v17  ;;  %283 = vmatprep.mubr.f32.mxu1 %v549_v17 }
  0xc1   :  { %402 = vmatmul.mubr.msk.f32.gmra.mrb[4].mxu0 %vm149_vm1, %v141_v62  ;;  %407 = vmatmul.mubr.msk.f32.gmra.mrb[4].mxu1 %vm149_vm1, %v146_v63 }
  0xc2   :  { %263 = vmatprep.mubr.f32.mxu0 %v549_v17  ;;  %288 = vmatprep.mubr.f32.mxu1 %v549_v17 }
  0xc5   :  { %403 = vmatmul.mubr.msk.f32.gmra.mrb[6].mxu0 %vm149_vm1, %v142_v0  ;;  %408 = vmatmul.mubr.msk.f32.gmra.mrb[6].mxu1 %vm149_vm1, %v147_v1 }
  0xc6   :  { %268 = vmatprep.mubr.f32.mxu0 %v549_v17  ;;  %293 = vmatprep.mubr.f32.mxu1 %v549_v17 }
  0xc9   :  { %404 = vmatmul.mubr.msk.f32.gmra.mrb[8].mxu0 %vm149_vm1, %v143_v2  ;;  %409 = vmatmul.mubr.msk.f32.gmra.mrb[8].mxu1 %vm149_vm1, %v148_v3 }
 0x18c   :  { %v250_v4 = vpop.f32.mrb[0].mxu0  ;;  %v275_v5 = vpop.f32.mrb[0].mxu1 }
 0x18d   :  { %v252_v6 = vpop.f32.mrb[1].mxu0  ;;  %v276_v7 = vpop.f32.mrb[1].mxu1 }
 0x190   :  { %v255_v8 = vpop.f32.mrb[2].mxu0  ;;  %v280_v9 = vpop.f32.mrb[2].mxu1 }
 0x191   :  { %v299_v10 = vmax.f32 %v250_v4, %v255_v8  ;;  %v257_v11 = vpop.f32.mrb[3].mxu0  ;;  %v281_v12 = vpop.f32.mrb[3].mxu1 }
 0x193   :  { %v300_v13 = vrot.slane %v299_v10, 4 }
 0x194   :  { %v260_v14 = vpop.f32.mrb[4].mxu0  ;;  %v285_v15 = vpop.f32.mrb[4].mxu1 }
 0x195   :  { %v301_v16 = vmax.f32 %v299_v10, %v300_v13  ;;  %v261_v17 = vpop.f32.mrb[5].mxu0  ;;  %v286_v18 = vpop.f32.mrb[5].mxu1 }
 0x197   :  { %v302_v19 = vsub.f32 %v250_v4, %v301_v16  ;;  %v305_v20 = vsub.f32 %v255_v8, %v301_v16 }
 0x198   :  { %v265_v21 = vpop.f32.mrb[6].mxu0  ;;  %v290_v22 = vpop.f32.mrb[6].mxu1 }
 0x199   :  { %v303_v23 = vmul.f32 1.442695, %v302_v19  ;;  %v306_v24 = vmul.f32 1.442695, %v305_v20  ;;  %v266_v25 = vpop.f32.mrb[7].mxu0  ;;  %v291_v26 = vpop.f32.mrb[7].mxu1 }
 0x19b   :  { %467 = vpow2.f32 %v303_v23 }
 0x19c   :  { %469 = vpow2.f32 %v306_v24  ;;  %v270_v27 = vpop.f32.mrb[8].mxu0  ;;  %v295_v28 = vpop.f32.mrb[8].mxu1 }
 0x19d   :  { %v271_v29 = vpop.f32.mrb[9].mxu0  ;;  %v296_v30 = vpop.f32.mrb[9].mxu1 }
 0x1a5   :  { %v468_v31 = vpop.eup %467 }
 0x1a6   :  { %v470_v32 = vpop.eup %469 }
 0x1a7   :  { %v308_v33 = vadd.f32 %v470_v32, %v468_v31 }
 0x1a9   :  { %v309_v34 = vrot.slane %v308_v33, 4 }
 0x1ab   :  { %v310_v35 = vadd.f32 %v309_v34, %v308_v33 }
 0x1ad   :  { %471 = vrcp.f32 %v310_v35 }
 0x1b7   :  { %v472_v36 = vpop.eup %471 }
 0x1b8   :  { %v314_v37 = vmul.f32 %v472_v36, %v470_v32  ;;  %v313_v38 = vmul.f32 %v472_v36, %v468_v31 }
 0x1ba   :  { %v316_v39 = vrot.slane %v314_v37, 4  ;;  %v317_v40 = vmul.f32 %v313_v38, %v261_v17  ;;  %v324_v41 = vmul.f32 %v313_v38, %v281_v12  ;;  %v315_v42 = vrot.slane %v313_v38, 4 }
 0x1bb   :  { %v320_v43 = vmul.f32 %v314_v37, %v271_v29  ;;  %v327_v44 = vmul.f32 %v314_v37, %v291_v26 }
 0x1bc   :  { %v322_v45 = vmul.f32 %v316_v39, %v276_v7  ;;  %v318_v46 = vmul.f32 %v315_v42, %v266_v25  ;;  %v325_v47 = vmul.f32 %v315_v42, %v286_v18  ;;  %v329_v48 = vmul.f32 %v316_v39, %v296_v30 }
 0x1be   :  { %v319_v49 = vadd.f32 %v318_v46, %v317_v40  ;;  %v326_v50 = vadd.f32 %v325_v47, %v324_v41 }
 0x1c0   :  { %v328_v51 = vadd.f32 %v327_v44, %v326_v50  ;;  %v321_v52 = vadd.f32 %v320_v43, %v319_v49 }
 0x1c2   :  { %v323_v53 = vadd.f32 %v322_v45, %v321_v52  ;;  %v330_v54 = vadd.f32 %v329_v48, %v328_v51 }
 0x1c4   :  { %331 = vxpose.xlu1.b32.start [1/2] (short) %v323_v53, 128 }
 0x1c8   :  { %332 = vxpose.xlu1.b32.end [2/2] (short) %v330_v54, 128 }
 0x244   :  { %v347_v55 = vpop.trf.xlu1 }
 0x245   :  { %364 = vst.msk [vmem:[#allocation7] sm:$0xff] %vm363_vm2, %v347_v55 }
 0x248   :  { %v348_v56 = vpop.trf.xlu1 }
 0x249   :  { %365 = vst.msk [vmem:[#allocation7 + $0x8] sm:$0xff] %vm363_vm2, %v348_v56 }
 0x24c   :  { %v349_v57 = vpop.trf.xlu1 }
 0x24d   :  { %366 = vst.msk [vmem:[#allocation7 + $0x10] sm:$0xff] %vm363_vm2, %v349_v57 }
 0x250   :  { %v350_v58 = vpop.trf.xlu1 }
 0x251   :  { %367 = vst.msk [vmem:[#allocation7 + $0x18] sm:$0xff] %vm363_vm2, %v350_v58 }
 0x254   :  { %v351_v59 = vpop.trf.xlu1 }
 0x255   :  { %368 = vst.msk [vmem:[#allocation7 + $0x20] sm:$0xff] %vm363_vm2, %v351_v59 }
 0x258   :  { %v352_v60 = vpop.trf.xlu1 }
 0x259   :  { %369 = vst.msk [vmem:[#allocation7 + $0x28] sm:$0xff] %vm363_vm2, %v352_v60 }
 0x25c   :  { %v353_v61 = vpop.trf.xlu1 }
 0x25d   :  { %370 = vst.msk [vmem:[#allocation7 + $0x30] sm:$0xff] %vm363_vm2, %v353_v61 }
 0x260   :  { %v354_v62 = vpop.trf.xlu1 }
 0x261   :  { %371 = vst.msk [vmem:[#allocation7 + $0x38] sm:$0xff] %vm363_vm2, %v354_v62 }
 0x264   :  { %v355_v63 = vpop.trf.xlu1 }
 0x265   :  { %372 = vst.msk [vmem:[#allocation7 + $0x40] sm:$0xff] %vm363_vm2, %v355_v63 }
 0x268   :  { %v356_v0 = vpop.trf.xlu1 }
 0x269   :  { %373 = vst.msk [vmem:[#allocation7 + $0x48] sm:$0xff] %vm363_vm2, %v356_v0 }
 0x26c   :  { %v357_v1 = vpop.trf.xlu1 }
 0x26d   :  { %374 = vst.msk [vmem:[#allocation7 + $0x50] sm:$0xff] %vm363_vm2, %v357_v1 }
 0x270   :  { %v358_v2 = vpop.trf.xlu1 }
 0x271   :  { %375 = vst.msk [vmem:[#allocation7 + $0x58] sm:$0xff] %vm363_vm2, %v358_v2 }
 0x274   :  { %v359_v3 = vpop.trf.xlu1 }
 0x275   :  { %376 = vst.msk [vmem:[#allocation7 + $0x60] sm:$0xff] %vm363_vm2, %v359_v3 }
 0x278   :  { %v360_v4 = vpop.trf.xlu1 }
 0x279   :  { %377 = vst.msk [vmem:[#allocation7 + $0x68] sm:$0xff] %vm363_vm2, %v360_v4 }
 0x27c   :  { %v361_v5 = vpop.trf.xlu1 }
 0x27d   :  { %378 = vst.msk [vmem:[#allocation7 + $0x70] sm:$0xff] %vm363_vm2, %v361_v5 }
 0x280   :  { %v362_v6 = vpop.trf.xlu1 }
 0x281   :  { %379 = vst.msk [vmem:[#allocation7 + $0x78] sm:$0xff] %vm363_vm2, %v362_v6 }
 0x282   :  { %528 = shalt.err (!%p525_p6)
}
 0x283   :  { %s529_s8 = scalar_lea.hbm %s686_s3, 2048 }
 0x284   :  { %p530_p7 = scmp.ne.s32.totalorder %s686_s3, %s529_s8  ;;  %p533_p8 = scmp.lt.u32.totalorder %s529_s8, %s686_s3 }
 0x286   :  { %p535_p9 = pnand %p533_p8, %p530_p7 }
 0x288   :  { %538 = shalt.err (!%p535_p9)
}
 0x289   :  { %391 = dma.vmem_to_hbm [thread:$0]  %s386_s4, 2048, %s686_s3, [#allocation4], %s546_s22, %s546_s22, %s547_s23  }
 0x28a   :  { %543 = dma.done.wait [#allocation4], 2048  }
 0x28b   :  { %544 = vsyncadd [#allocation4], 4294965248 }
 0x28c   :  { %395 = vsyncpa [#allocation3], 1 }
 0x28d   :  { %396 = vsyncpa [#allocation6], 1 }
 0x28e   :  { %397 = vsyncpa [#allocation4], 1 }

</bundles_post_ra>
